<compile_context>
chip_gen: v7x
topology: tpu7x:2x2x1
jax: 0.10.0
libtpu: 0.0.40
codegen_flags: <defaults>
</compile_context>

<pallas_src>
import functools

import jax
import jax.numpy as jnp
import numpy as np
from jax.experimental import pallas as pl
from jax.experimental.pallas import tpu as pltpu

OUT_DIM = {2: 39, 4: 35, 6: 31}
OUT_DIM_64 = {2: 29, 4: 25, 6: 21}

_SUB = 16     # row-count rounding (bf16 packs 16 rows per vreg)
_CHUNK = 256  # rows per in-kernel matmul chunk (vreg-resident f32 accumulator)


def _round_up(x, m):
    return ((x + m - 1) // m) * m


def _chunks(total, chunk):
    out, b = [], 0
    while b < total:
        out.append((b, min(chunk, total - b)))
        b += chunk
    return tuple(out)


def _geometry(H, W, num_layers):
    """Wide row-major activation geometry (flat row stride S = ceil(W/2))."""
    assert num_layers >= 2
    Hp, Wp = (H + 1) // 2, (W + 1) // 2            # 2x2-phase grid of the input
    H1, W1 = (H - 3) // 2 + 1, (W - 3) // 2 + 1    # conv0 (stride-2) output size
    S = Wp                                         # flat-row stride of activations
    halo = 2 * S + 2                               # largest 3x3 tap row shift
    r_pad = []
    for l in range(1, num_layers):
        h_out = H1 - 2 * l
        assert h_out > 0, "image too small for num_layers"
        r_pad.append(_round_up(h_out * S, _SUB))   # rows written by fused layer l
    r_pad = tuple(r_pad)
    mrows = _round_up(r_pad[0] + halo, _SUB)       # rows written by conv0
    plane_rows = _round_up(mrows + S + 2, 8)       # phase-plane rows (zero padded)
    # Every halo read of every fused layer lands inside rows conv0 writes, and
    # every conv0 read lands inside the (zero-padded) phase planes.  Garbage
    # rows/columns outside the valid window never feed a valid output.
    for rl in r_pad:
        assert rl + halo <= mrows
    assert plane_rows >= Hp * Wp
    return Hp, Wp, H1, W1, S, r_pad, mrows, plane_rows


def _shared_cnn_kernel(scale_ref, x_ref, w0_ref, b0_ref, wt_ref, bt_ref,
                       o_ref, a_ref, *, num_layers, S, mrows, r_pad):
    """Whole SharedCNN forward for one image, fully resident in VMEM.

    scale_ref (1, 1)                 f32  : NormalizeImg scale (1/255 or 1)
    x_ref     (1, plane_rows, 4*Cin) bf16 : 2x2-phase-packed input rows
    w0_ref    (4, 4*Cin, C)          bf16 : conv0 weights grouped by row shift
    b0_ref    (1, C)                 f32
    wt_ref    (9*(L-1), C, C)        bf16 : stride-1 per-tap weights (transposed)
    bt_ref    (L-1, 1, C)            f32
    o_ref     (1, r_last, C)         f32  : last conv output (wide rows, no ReLU)
    a_ref     (mrows, C)             bf16 : resident activation scratch (in-place)
    """
    scl = scale_ref[...]                     # (1, 1) f32
    d_offs = (0, 1, S, S + 1)                # conv0 phase-group flat-row shifts

    # ---- layer 0: stride-2 conv (+ fused NormalizeImg scale + ReLU) --------
    for base, rows in _chunks(mrows, _CHUNK):
        acc = jnp.dot(x_ref[0, pl.ds(base + d_offs[0], rows), :], w0_ref[0],
                      preferred_element_type=jnp.float32)
        for d in range(1, 4):
            acc += jnp.dot(x_ref[0, pl.ds(base + d_offs[d], rows), :],
                           w0_ref[d], preferred_element_type=jnp.float32)
        y = acc * scl + b0_ref[...]          # conv(s*x) == s*conv(x); bias unscaled
        a_ref[pl.ds(base, rows), :] = jnp.maximum(y, 0.0).astype(a_ref.dtype)

    # ---- stride-1 layers, in-place over a_ref (chunks in increasing order,
    #      so every read sees previous-layer values; vreg f32 accumulation) ---
    for l in range(1, num_layers):
        last = l == num_layers - 1
        for base, rows in _chunks(r_pad[l - 1], _CHUNK):
            acc = None
            for j in range(9):
                off = (j // 3) * S + (j % 3)     # flat-row shift of tap (kh, kw)
                contrib = jnp.dot(a_ref[pl.ds(base + off, rows), :],
                                  wt_ref[(l - 1) * 9 + j],
                                  preferred_element_type=jnp.float32)
                acc = contrib if acc is None else acc + contrib
            y = acc + bt_ref[l - 1]
            if last:
                o_ref[0, pl.ds(base, rows), :] = y.astype(o_ref.dtype)
            else:
                a_ref[pl.ds(base, rows), :] = jnp.maximum(y, 0.0).astype(a_ref.dtype)


class SharedCNNPallas:
    """JAX/Pallas re-implementation of SharedCNN.forward (NCHW in / NCHW out)."""

    def __init__(self, obs_shape, num_layers, num_filters, key):
        assert len(obs_shape) == 3
        assert num_layers >= 2
        self.obs_shape = obs_shape
        self.num_layers = num_layers
        self.num_filters = num_filters
        self.out_dim = (OUT_DIM_64[num_layers] if obs_shape[-1] == 64
                        else OUT_DIM[num_layers])

        # PyTorch Conv2d default init: U(-1/sqrt(fan_in), +1/sqrt(fan_in)).
        self.params = []
        in_ch = obs_shape[0]
        for _ in range(num_layers):
            key, k_w, k_b = jax.random.split(key, 3)
            bound = 1.0 / ((in_ch * 9) ** 0.5)
            w = jax.random.uniform(k_w, (num_filters, in_ch, 3, 3),
                                   jnp.float32, -bound, bound)
            b = jax.random.uniform(k_b, (num_filters,), jnp.float32,
                                   -bound, bound)
            self.params.append((w, b))
            in_ch = num_filters

        # ---- call-invariant weight packing (hoisted out of the hot path) ----
        C, Cin = num_filters, obs_shape[0]
        w0, b0 = self.params[0]
        # Conv0 taps grouped by flat-row shift d=(kh//2, kw//2); within a group
        # each tap's (Cin, C) matrix sits at the lane block of its input phase
        # p=(kh%2, kw%2) so one dot per shift contracts over all its taps.
        w0p = jnp.zeros((4, 4 * Cin, C), jnp.float32)
        for kh in range(3):
            for kw in range(3):
                d = (kh // 2) * 2 + (kw // 2)
                p = (kh % 2) * 2 + (kw % 2)
                w0p = w0p.at[d, p * Cin:(p + 1) * Cin, :].set(
                    jnp.transpose(w0[:, :, kh, kw]))
        self._w0p = w0p.astype(jnp.bfloat16)                  # (4, 4*Cin, C)
        self._b0 = b0.astype(jnp.float32).reshape(1, C)

        taps, biases = [], []
        for (w, b) in self.params[1:]:
            for kh in range(3):
                for kw in range(3):
                    taps.append(jnp.transpose(w[:, :, kh, kw]))
            biases.append(b.astype(jnp.float32).reshape(1, C))
        self._wt = jnp.stack(taps).astype(jnp.bfloat16)       # (9*(L-1), C, C)
        self._bt = jnp.stack(biases).astype(jnp.float32)      # (L-1, 1, C)

    def __call__(self, x_nchw):
        L, C = self.num_layers, self.num_filters
        x = jnp.asarray(x_nchw, jnp.float32)
        N, Cin, H, W = x.shape

        # NormalizeImg: divide by 255 when max > 1 (folded into conv0 epilogue).
        # TODO(synk): original NormalizeImg returns None when x.max() <= 1 (a
        #             bug); here the input passes through unscaled instead.
        scale = jnp.where(jnp.max(x) > 1.0, 1.0 / 255.0, 1.0)
        scale = scale.astype(jnp.float32).reshape(1, 1)

        Hp, Wp, H1, W1, S, r_pad, mrows, plane_rows = _geometry(H, W, L)

        # 2x2-phase packing of the input: a single same-size relayout pass (no
        # im2col amplification).  Row i*Wp+j holds x[:, 2i+ph, 2j+pw] for the 4
        # phases stacked along the lane axis; trailing rows are zero padded so
        # conv0's halo reads never go out of bounds.
        xb = x.astype(jnp.bfloat16)
        xb = jnp.pad(xb, ((0, 0), (0, 0), (0, 2 * Hp - H), (0, 2 * Wp - W)))
        ph = xb.reshape(N, Cin, Hp, 2, Wp, 2)
        ph = jnp.transpose(ph, (0, 2, 4, 3, 5, 1))       # (N, Hp, Wp, ph, pw, Cin)
        ph = ph.reshape(N, Hp * Wp, 4 * Cin)
        ph = jnp.pad(ph, ((0, 0), (0, plane_rows - Hp * Wp), (0, 0)))

        r_last = r_pad[-1]
        kernel = functools.partial(_shared_cnn_kernel, num_layers=L, S=S,
                                   mrows=mrows, r_pad=r_pad)
        # NOTE: grid=(N,) "parallel" load-balances v7x's two TensorCores only
        # for N >= 2; typical RL batches satisfy this.
        out_wide = pl.pallas_call(
            kernel,
            out_shape=jax.ShapeDtypeStruct((N, r_last, C), jnp.float32),
            grid=(N,),
            in_specs=[
                pl.BlockSpec((1, 1), lambda n: (0, 0)),                   # scale
                pl.BlockSpec((1, plane_rows, 4 * Cin), lambda n: (n, 0, 0)),
                pl.BlockSpec((4, 4 * Cin, C), lambda n: (0, 0, 0)),       # resident
                pl.BlockSpec((1, C), lambda n: (0, 0)),                   # resident
                pl.BlockSpec((9 * (L - 1), C, C), lambda n: (0, 0, 0)),   # resident
                pl.BlockSpec((L - 1, 1, C), lambda n: (0, 0, 0)),         # resident
            ],
            out_specs=pl.BlockSpec((1, r_last, C), lambda n: (n, 0, 0)),
            scratch_shapes=[pltpu.VMEM((mrows, C), jnp.bfloat16)],
            compiler_params=pltpu.CompilerParams(
                dimension_semantics=("parallel",)),
        )(scale, ph, self._w0p, self._b0, self._wt, self._bt)

        # Extract the valid (od_h, od_w) window from the wide rows, back to NCHW.
        od_h, od_w = H1 - 2 * (L - 1), W1 - 2 * (L - 1)
        y = out_wide[:, :od_h * S, :].reshape(N, od_h, S, C)[:, :, :od_w, :]
        return jnp.transpose(y, (0, 3, 1, 2))


# ---------------------------------------------------------------------------
# Pure-JAX reference (for correctness check only).
# ---------------------------------------------------------------------------
def _reference_forward(x_nchw, params):
    scale = jnp.where(jnp.max(x_nchw) > 1.0, 1.0 / 255.0, 1.0)
    y = x_nchw * scale
    for i, (w, b) in enumerate(params):
        if i > 0:
            y = jnp.maximum(y, 0.0)
        y = jax.lax.conv_general_dilated(
            y, w, window_strides=(2, 2) if i == 0 else (1, 1), padding="VALID",
            dimension_numbers=("NCHW", "OIHW", "NCHW"))
        y = y + b.reshape(1, -1, 1, 1)
    return y


if __name__ == "__main__":
    key = jax.random.PRNGKey(0)
    k_x, k_p = jax.random.split(key)

    # small shapes: batch=2, channels=4, spatial=16, num_layers=2, filters=32
    obs_shape = (4, 16, 16)
    batch, num_layers, num_filters = 2, 2, 32
    x = jax.random.uniform(k_x, (batch,) + obs_shape, jnp.float32, 0.0, 255.0)

    model = SharedCNNPallas(obs_shape, num_layers, num_filters, key=k_p)
    out = jax.block_until_ready(model(x))

    # 16 --(3x3, s2)--> 7 --(3x3, s1)--> 5
    assert out.shape == (batch, num_filters, 5, 5), out.shape
    assert out.dtype == jnp.float32

    ref = jax.block_until_ready(_reference_forward(x, model.params))
    np.testing.assert_allclose(np.asarray(out), np.asarray(ref),
                               rtol=1e-1, atol=1e-1)
    print("KERNEL_OK")
</pallas_src>

<mosaic_0001>
module attributes {stable_mosaic.version = 11 : i64} {
  func.func @_shared_cnn_kernel(%arg0: i32, %arg1: memref<1x1xf32, #tpu.memory_space<vmem>>, %arg2: memref<1x96x16xbf16, #tpu.memory_space<vmem>>, %arg3: memref<4x16x32xbf16, #tpu.memory_space<vmem>>, %arg4: memref<1x32xf32, #tpu.memory_space<vmem>>, %arg5: memref<9x32x32xbf16, #tpu.memory_space<vmem>>, %arg6: memref<1x1x32xf32, #tpu.memory_space<vmem>>, %arg7: memref<1x48x32xf32, #tpu.memory_space<vmem>>, %arg8: memref<80x32xbf16, #tpu.memory_space<vmem>>) attributes {dimension_semantics = [#tpu.dimension_semantics<parallel>], iteration_bounds = array<i64: 2>, scalar_prefetch = 0 : i64, scratch_operands = 1 : i64, tpu.core_type = #tpu.core_type<tc>, window_params = [{pipeline_mode = #tpu.pipeline_mode<synchronous>, transform_indices = @transform_0, window_bounds = array<i64: 1, 1>}, {transform_indices = @transform_1, window_bounds = array<i64: 1, 96, 16>}, {pipeline_mode = #tpu.pipeline_mode<synchronous>, transform_indices = @transform_2, window_bounds = array<i64: 4, 16, 32>}, {pipeline_mode = #tpu.pipeline_mode<synchronous>, transform_indices = @transform_3, window_bounds = array<i64: 1, 32>}, {pipeline_mode = #tpu.pipeline_mode<synchronous>, transform_indices = @transform_4, window_bounds = array<i64: 9, 32, 32>}, {pipeline_mode = #tpu.pipeline_mode<synchronous>, transform_indices = @transform_5, window_bounds = array<i64: 1, 1, 32>}, {transform_indices = @transform_6, window_bounds = array<i64: 1, 48, 32>}]} {
    %c0 = arith.constant 0 : index
    %c0_0 = arith.constant 0 : index
    %0 = vector.load %arg1[%c0, %c0_0] : memref<1x1xf32, #tpu.memory_space<vmem>>, vector<1x1xf32>
    %c0_1 = arith.constant 0 : index
    %c0_2 = arith.constant 0 : index
    %c0_3 = arith.constant 0 : index
    %1 = vector.load %arg2[%c0_1, %c0_2, %c0_3] : memref<1x96x16xbf16, #tpu.memory_space<vmem>>, vector<1x80x16xbf16>
    %2 = vector.shape_cast %1 : vector<1x80x16xbf16> to vector<80x16xbf16>
    %c0_4 = arith.constant 0 : index
    %c0_5 = arith.constant 0 : index
    %c0_6 = arith.constant 0 : index
    %3 = vector.load %arg3[%c0_4, %c0_5, %c0_6] : memref<4x16x32xbf16, #tpu.memory_space<vmem>>, vector<1x16x32xbf16>
    %4 = vector.shape_cast %3 : vector<1x16x32xbf16> to vector<16x32xbf16>
    %cst = arith.constant dense<0.000000e+00> : vector<80x32xf32>
    %5 = tpu.matmul %2, %4, %cst {dimension_numbers = #tpu.dot_dimension_numbers<[1], [0], [0], [1], [0, 0, 1, 1], [], []>} : vector<80x16xbf16>, vector<16x32xbf16>, vector<80x32xf32> -> vector<80x32xf32>
    %c0_7 = arith.constant 0 : index
    %c1 = arith.constant 1 : index
    %c0_8 = arith.constant 0 : index
    %6 = vector.load %arg2[%c0_7, %c1, %c0_8] : memref<1x96x16xbf16, #tpu.memory_space<vmem>>, vector<1x80x16xbf16>
    %7 = vector.shape_cast %6 : vector<1x80x16xbf16> to vector<80x16xbf16>
    %c1_9 = arith.constant 1 : index
    %c0_10 = arith.constant 0 : index
    %c0_11 = arith.constant 0 : index
    %8 = vector.load %arg3[%c1_9, %c0_10, %c0_11] : memref<4x16x32xbf16, #tpu.memory_space<vmem>>, vector<1x16x32xbf16>
    %9 = vector.shape_cast %8 : vector<1x16x32xbf16> to vector<16x32xbf16>
    %cst_12 = arith.constant dense<0.000000e+00> : vector<80x32xf32>
    %10 = tpu.matmul %7, %9, %cst_12 {dimension_numbers = #tpu.dot_dimension_numbers<[1], [0], [0], [1], [0, 0, 1, 1], [], []>} : vector<80x16xbf16>, vector<16x32xbf16>, vector<80x32xf32> -> vector<80x32xf32>
    %11 = arith.addf %5, %10 : vector<80x32xf32>
    %c0_13 = arith.constant 0 : index
    %c8 = arith.constant 8 : index
    %c0_14 = arith.constant 0 : index
    %12 = vector.load %arg2[%c0_13, %c8, %c0_14] : memref<1x96x16xbf16, #tpu.memory_space<vmem>>, vector<1x80x16xbf16>
    %13 = vector.shape_cast %12 : vector<1x80x16xbf16> to vector<80x16xbf16>
    %c2 = arith.constant 2 : index
    %c0_15 = arith.constant 0 : index
    %c0_16 = arith.constant 0 : index
    %14 = vector.load %arg3[%c2, %c0_15, %c0_16] : memref<4x16x32xbf16, #tpu.memory_space<vmem>>, vector<1x16x32xbf16>
    %15 = vector.shape_cast %14 : vector<1x16x32xbf16> to vector<16x32xbf16>
    %cst_17 = arith.constant dense<0.000000e+00> : vector<80x32xf32>
    %16 = tpu.matmul %13, %15, %cst_17 {dimension_numbers = #tpu.dot_dimension_numbers<[1], [0], [0], [1], [0, 0, 1, 1], [], []>} : vector<80x16xbf16>, vector<16x32xbf16>, vector<80x32xf32> -> vector<80x32xf32>
    %17 = arith.addf %11, %16 : vector<80x32xf32>
    %c0_18 = arith.constant 0 : index
    %c9 = arith.constant 9 : index
    %c0_19 = arith.constant 0 : index
    %18 = vector.load %arg2[%c0_18, %c9, %c0_19] : memref<1x96x16xbf16, #tpu.memory_space<vmem>>, vector<1x80x16xbf16>
    %19 = vector.shape_cast %18 : vector<1x80x16xbf16> to vector<80x16xbf16>
    %c3 = arith.constant 3 : index
    %c0_20 = arith.constant 0 : index
    %c0_21 = arith.constant 0 : index
    %20 = vector.load %arg3[%c3, %c0_20, %c0_21] : memref<4x16x32xbf16, #tpu.memory_space<vmem>>, vector<1x16x32xbf16>
    %21 = vector.shape_cast %20 : vector<1x16x32xbf16> to vector<16x32xbf16>
    %cst_22 = arith.constant dense<0.000000e+00> : vector<80x32xf32>
    %22 = tpu.matmul %19, %21, %cst_22 {dimension_numbers = #tpu.dot_dimension_numbers<[1], [0], [0], [1], [0, 0, 1, 1], [], []>} : vector<80x16xbf16>, vector<16x32xbf16>, vector<80x32xf32> -> vector<80x32xf32>
    %23 = arith.addf %17, %22 : vector<80x32xf32>
    %24 = vector.broadcast %0 : vector<1x1xf32> to vector<80x32xf32>
    %25 = arith.mulf %23, %24 : vector<80x32xf32>
    %c0_23 = arith.constant 0 : index
    %c0_24 = arith.constant 0 : index
    %26 = vector.load %arg4[%c0_23, %c0_24] : memref<1x32xf32, #tpu.memory_space<vmem>>, vector<1x32xf32>
    %27 = vector.broadcast %26 : vector<1x32xf32> to vector<80x32xf32>
    %28 = arith.addf %25, %27 : vector<80x32xf32>
    %cst_25 = arith.constant 0.000000e+00 : f32
    %29 = vector.broadcast %cst_25 : f32 to vector<80x32xf32>
    %30 = arith.maximumf %28, %29 : vector<80x32xf32>
    %31 = arith.truncf %30 : vector<80x32xf32> to vector<80x32xbf16>
    %c0_26 = arith.constant 0 : index
    %c0_27 = arith.constant 0 : index
    %32 = vector.load %arg8[%c0_26, %c0_27] : memref<80x32xbf16, #tpu.memory_space<vmem>>, vector<80x32xbf16>
    tpu.vector_store %arg8[%c0_26, %c0_27], %31 {strides = array<i32>} : memref<80x32xbf16, #tpu.memory_space<vmem>>, vector<80x32xbf16>,
    %c0_28 = arith.constant 0 : index
    %c0_29 = arith.constant 0 : index
    %33 = vector.load %arg8[%c0_28, %c0_29] : memref<80x32xbf16, #tpu.memory_space<vmem>>, vector<48x32xbf16>
    %c0_30 = arith.constant 0 : index
    %c0_31 = arith.constant 0 : index
    %c0_32 = arith.constant 0 : index
    %34 = vector.load %arg5[%c0_30, %c0_31, %c0_32] : memref<9x32x32xbf16, #tpu.memory_space<vmem>>, vector<1x32x32xbf16>
    %35 = vector.shape_cast %34 : vector<1x32x32xbf16> to vector<32x32xbf16>
    %cst_33 = arith.constant dense<0.000000e+00> : vector<48x32xf32>
    %36 = tpu.matmul %33, %35, %cst_33 {dimension_numbers = #tpu.dot_dimension_numbers<[1], [0], [0], [1], [0, 0, 1, 1], [], []>} : vector<48x32xbf16>, vector<32x32xbf16>, vector<48x32xf32> -> vector<48x32xf32>
    %c1_34 = arith.constant 1 : index
    %c0_35 = arith.constant 0 : index
    %37 = vector.load %arg8[%c1_34, %c0_35] : memref<80x32xbf16, #tpu.memory_space<vmem>>, vector<48x32xbf16>
    %c1_36 = arith.constant 1 : index
    %c0_37 = arith.constant 0 : index
    %c0_38 = arith.constant 0 : index
    %38 = vector.load %arg5[%c1_36, %c0_37, %c0_38] : memref<9x32x32xbf16, #tpu.memory_space<vmem>>, vector<1x32x32xbf16>
    %39 = vector.shape_cast %38 : vector<1x32x32xbf16> to vector<32x32xbf16>
    %cst_39 = arith.constant dense<0.000000e+00> : vector<48x32xf32>
    %40 = tpu.matmul %37, %39, %cst_39 {dimension_numbers = #tpu.dot_dimension_numbers<[1], [0], [0], [1], [0, 0, 1, 1], [], []>} : vector<48x32xbf16>, vector<32x32xbf16>, vector<48x32xf32> -> vector<48x32xf32>
    %41 = arith.addf %36, %40 : vector<48x32xf32>
    %c2_40 = arith.constant 2 : index
    %c0_41 = arith.constant 0 : index
    %42 = vector.load %arg8[%c2_40, %c0_41] : memref<80x32xbf16, #tpu.memory_space<vmem>>, vector<48x32xbf16>
    %c2_42 = arith.constant 2 : index
    %c0_43 = arith.constant 0 : index
    %c0_44 = arith.constant 0 : index
    %43 = vector.load %arg5[%c2_42, %c0_43, %c0_44] : memref<9x32x32xbf16, #tpu.memory_space<vmem>>, vector<1x32x32xbf16>
    %44 = vector.shape_cast %43 : vector<1x32x32xbf16> to vector<32x32xbf16>
    %cst_45 = arith.constant dense<0.000000e+00> : vector<48x32xf32>
    %45 = tpu.matmul %42, %44, %cst_45 {dimension_numbers = #tpu.dot_dimension_numbers<[1], [0], [0], [1], [0, 0, 1, 1], [], []>} : vector<48x32xbf16>, vector<32x32xbf16>, vector<48x32xf32> -> vector<48x32xf32>
    %46 = arith.addf %41, %45 : vector<48x32xf32>
    %c8_46 = arith.constant 8 : index
    %c0_47 = arith.constant 0 : index
    %47 = vector.load %arg8[%c8_46, %c0_47] : memref<80x32xbf16, #tpu.memory_space<vmem>>, vector<48x32xbf16>
    %c3_48 = arith.constant 3 : index
    %c0_49 = arith.constant 0 : index
    %c0_50 = arith.constant 0 : index
    %48 = vector.load %arg5[%c3_48, %c0_49, %c0_50] : memref<9x32x32xbf16, #tpu.memory_space<vmem>>, vector<1x32x32xbf16>
    %49 = vector.shape_cast %48 : vector<1x32x32xbf16> to vector<32x32xbf16>
    %cst_51 = arith.constant dense<0.000000e+00> : vector<48x32xf32>
    %50 = tpu.matmul %47, %49, %cst_51 {dimension_numbers = #tpu.dot_dimension_numbers<[1], [0], [0], [1], [0, 0, 1, 1], [], []>} : vector<48x32xbf16>, vector<32x32xbf16>, vector<48x32xf32> -> vector<48x32xf32>
    %51 = arith.addf %46, %50 : vector<48x32xf32>
    %c9_52 = arith.constant 9 : index
    %c0_53 = arith.constant 0 : index
    %52 = vector.load %arg8[%c9_52, %c0_53] : memref<80x32xbf16, #tpu.memory_space<vmem>>, vector<48x32xbf16>
    %c4 = arith.constant 4 : index
    %c0_54 = arith.constant 0 : index
    %c0_55 = arith.constant 0 : index
    %53 = vector.load %arg5[%c4, %c0_54, %c0_55] : memref<9x32x32xbf16, #tpu.memory_space<vmem>>, vector<1x32x32xbf16>
    %54 = vector.shape_cast %53 : vector<1x32x32xbf16> to vector<32x32xbf16>
    %cst_56 = arith.constant dense<0.000000e+00> : vector<48x32xf32>
    %55 = tpu.matmul %52, %54, %cst_56 {dimension_numbers = #tpu.dot_dimension_numbers<[1], [0], [0], [1], [0, 0, 1, 1], [], []>} : vector<48x32xbf16>, vector<32x32xbf16>, vector<48x32xf32> -> vector<48x32xf32>
    %56 = arith.addf %51, %55 : vector<48x32xf32>
    %c10 = arith.constant 10 : index
    %c0_57 = arith.constant 0 : index
    %57 = vector.load %arg8[%c10, %c0_57] : memref<80x32xbf16, #tpu.memory_space<vmem>>, vector<48x32xbf16>
    %c5 = arith.constant 5 : index
    %c0_58 = arith.constant 0 : index
    %c0_59 = arith.constant 0 : index
    %58 = vector.load %arg5[%c5, %c0_58, %c0_59] : memref<9x32x32xbf16, #tpu.memory_space<vmem>>, vector<1x32x32xbf16>
    %59 = vector.shape_cast %58 : vector<1x32x32xbf16> to vector<32x32xbf16>
    %cst_60 = arith.constant dense<0.000000e+00> : vector<48x32xf32>
    %60 = tpu.matmul %57, %59, %cst_60 {dimension_numbers = #tpu.dot_dimension_numbers<[1], [0], [0], [1], [0, 0, 1, 1], [], []>} : vector<48x32xbf16>, vector<32x32xbf16>, vector<48x32xf32> -> vector<48x32xf32>
    %61 = arith.addf %56, %60 : vector<48x32xf32>
    %c16 = arith.constant 16 : index
    %c0_61 = arith.constant 0 : index
    %62 = vector.load %arg8[%c16, %c0_61] : memref<80x32xbf16, #tpu.memory_space<vmem>>, vector<48x32xbf16>
    %c6 = arith.constant 6 : index
    %c0_62 = arith.constant 0 : index
    %c0_63 = arith.constant 0 : index
    %63 = vector.load %arg5[%c6, %c0_62, %c0_63] : memref<9x32x32xbf16, #tpu.memory_space<vmem>>, vector<1x32x32xbf16>
    %64 = vector.shape_cast %63 : vector<1x32x32xbf16> to vector<32x32xbf16>
    %cst_64 = arith.constant dense<0.000000e+00> : vector<48x32xf32>
    %65 = tpu.matmul %62, %64, %cst_64 {dimension_numbers = #tpu.dot_dimension_numbers<[1], [0], [0], [1], [0, 0, 1, 1], [], []>} : vector<48x32xbf16>, vector<32x32xbf16>, vector<48x32xf32> -> vector<48x32xf32>
    %66 = arith.addf %61, %65 : vector<48x32xf32>
    %c17 = arith.constant 17 : index
    %c0_65 = arith.constant 0 : index
    %67 = vector.load %arg8[%c17, %c0_65] : memref<80x32xbf16, #tpu.memory_space<vmem>>, vector<48x32xbf16>
    %c7 = arith.constant 7 : index
    %c0_66 = arith.constant 0 : index
    %c0_67 = arith.constant 0 : index
    %68 = vector.load %arg5[%c7, %c0_66, %c0_67] : memref<9x32x32xbf16, #tpu.memory_space<vmem>>, vector<1x32x32xbf16>
    %69 = vector.shape_cast %68 : vector<1x32x32xbf16> to vector<32x32xbf16>
    %cst_68 = arith.constant dense<0.000000e+00> : vector<48x32xf32>
    %70 = tpu.matmul %67, %69, %cst_68 {dimension_numbers = #tpu.dot_dimension_numbers<[1], [0], [0], [1], [0, 0, 1, 1], [], []>} : vector<48x32xbf16>, vector<32x32xbf16>, vector<48x32xf32> -> vector<48x32xf32>
    %71 = arith.addf %66, %70 : vector<48x32xf32>
    %c18 = arith.constant 18 : index
    %c0_69 = arith.constant 0 : index
    %72 = vector.load %arg8[%c18, %c0_69] : memref<80x32xbf16, #tpu.memory_space<vmem>>, vector<48x32xbf16>
    %c8_70 = arith.constant 8 : index
    %c0_71 = arith.constant 0 : index
    %c0_72 = arith.constant 0 : index
    %73 = vector.load %arg5[%c8_70, %c0_71, %c0_72] : memref<9x32x32xbf16, #tpu.memory_space<vmem>>, vector<1x32x32xbf16>
    %74 = vector.shape_cast %73 : vector<1x32x32xbf16> to vector<32x32xbf16>
    %cst_73 = arith.constant dense<0.000000e+00> : vector<48x32xf32>
    %75 = tpu.matmul %72, %74, %cst_73 {dimension_numbers = #tpu.dot_dimension_numbers<[1], [0], [0], [1], [0, 0, 1, 1], [], []>} : vector<48x32xbf16>, vector<32x32xbf16>, vector<48x32xf32> -> vector<48x32xf32>
    %76 = arith.addf %71, %75 : vector<48x32xf32>
    %c0_74 = arith.constant 0 : index
    %c0_75 = arith.constant 0 : index
    %c0_76 = arith.constant 0 : index
    %77 = vector.load %arg6[%c0_74, %c0_75, %c0_76] : memref<1x1x32xf32, #tpu.memory_space<vmem>>, vector<1x1x32xf32>
    %78 = vector.shape_cast %77 : vector<1x1x32xf32> to vector<1x32xf32>
    %79 = vector.broadcast %78 : vector<1x32xf32> to vector<48x32xf32>
    %80 = arith.addf %76, %79 : vector<48x32xf32>
    %c0_77 = arith.constant 0 : index
    %c0_78 = arith.constant 0 : index
    %c0_79 = arith.constant 0 : index
    %81 = vector.load %arg7[%c0_77, %c0_78, %c0_79] : memref<1x48x32xf32, #tpu.memory_space<vmem>>, vector<1x48x32xf32>
    %82 = vector.shape_cast %81 : vector<1x48x32xf32> to vector<48x32xf32>
    %83 = vector.shape_cast %80 : vector<48x32xf32> to vector<1x48x32xf32>
    tpu.vector_store %arg7[%c0_77, %c0_78, %c0_79], %83 {strides = array<i32>} : memref<1x48x32xf32, #tpu.memory_space<vmem>>, vector<1x48x32xf32>,
    return
  }
  func.func @transform_0(%arg0: i32) -> (i32, i32) {
    %c0_i32 = arith.constant 0 : i32
    %c0_i32_0 = arith.constant 0 : i32
    %c0_i32_1 = arith.constant 0 : i32
    return %c0_i32, %c0_i32_0 : i32, i32
  }
  func.func @transform_1(%arg0: i32) -> (i32, i32, i32) {
    %c0_i32 = arith.constant 0 : i32
    %c0_i32_0 = arith.constant 0 : i32
    %c0_i32_1 = arith.constant 0 : i32
    return %arg0, %c0_i32, %c0_i32_0 : i32, i32, i32
  }
  func.func @transform_2(%arg0: i32) -> (i32, i32, i32) {
    %c0_i32 = arith.constant 0 : i32
    %c0_i32_0 = arith.constant 0 : i32
    %c0_i32_1 = arith.constant 0 : i32
    %c0_i32_2 = arith.constant 0 : i32
    return %c0_i32, %c0_i32_0, %c0_i32_1 : i32, i32, i32
  }
  func.func @transform_3(%arg0: i32) -> (i32, i32) {
    %c0_i32 = arith.constant 0 : i32
    %c0_i32_0 = arith.constant 0 : i32
    %c0_i32_1 = arith.constant 0 : i32
    return %c0_i32, %c0_i32_0 : i32, i32
  }
  func.func @transform_4(%arg0: i32) -> (i32, i32, i32) {
    %c0_i32 = arith.constant 0 : i32
    %c0_i32_0 = arith.constant 0 : i32
    %c0_i32_1 = arith.constant 0 : i32
    %c0_i32_2 = arith.constant 0 : i32
    return %c0_i32, %c0_i32_0, %c0_i32_1 : i32, i32, i32
  }
  func.func @transform_5(%arg0: i32) -> (i32, i32, i32) {
    %c0_i32 = arith.constant 0 : i32
    %c0_i32_0 = arith.constant 0 : i32
    %c0_i32_1 = arith.constant 0 : i32
    %c0_i32_2 = arith.constant 0 : i32
    return %c0_i32, %c0_i32_0, %c0_i32_1 : i32, i32, i32
  }
  func.func @transform_6(%arg0: i32) -> (i32, i32, i32) {
    %c0_i32 = arith.constant 0 : i32
    %c0_i32_0 = arith.constant 0 : i32
    %c0_i32_1 = arith.constant 0 : i32
    return %arg0, %c0_i32, %c0_i32_0 : i32, i32, i32
  }
}

</mosaic_0001>

<bundles_post_ra>
// kernel: tpu_custom_call.1
= control target key start
LH: loop header
LB: loop body
LE: loop exit
PB: predicated region body
PF: predicated region fallthrough
CT: control target
= control target key end

     0   :  { %s2998_s0 = inlined_call_operand.<no memory space> [shape: f32[1,1], index: 0, kind: input, shape index: {}]   ;;  %s2999_s1 = inlined_call_operand.vmem [shape: bf16[2,96,16], index: 1, kind: input, shape index: {}]   ;;  %s3000_s2 = inlined_call_operand.vmem [shape: bf16[4,16,32], index: 2, kind: input, shape index: {}]   ;;  %s3001_s3 = inlined_call_operand.vmem [shape: f32[1,32], index: 3, kind: input, shape index: {}]   ;;  %s3002_s4 = inlined_call_operand.hbm [shape: bf16[9,32,32], index: 4, kind: input, shape index: {}]   ;;  %s3003_s5 = inlined_call_operand.vmem [shape: f32[1,1,32], index: 5, kind: input, shape index: {}]   ;;  %s3004_s6 = inlined_call_operand.vmem [shape: f32[2,48,32], index: 6, kind: output, shape index: {}]  }
   0x1   :  { %v11_v0 = vstv %s2998_s0 }
   0x2   :  { %12 = vst [vmem:[#allocation3] sm:$0x1] %v11_v0 }
   0x3   :  { %13 = vsyncpa [#allocation5], 0  ;;  %s2527_s23 = smov 0  }
   0x4 LB: > { %s2533_s24 = sadd.s32 4294967295, %s2481_s23   ;;  %p1913_p0 = scmp.ge.s32.totalorder %s2481_s23, 1  ;;  %s2481_s23 = sphi %s2527_s23, %s19_s23  }
   0x5   : > { %p181_p1 = scmp.lt.s32.totalorder %s2481_s23, 3  ;;  %s2483_s25 = smov [#allocation4]  }
   0x6   : > { %s202_s0 = sshll.u32 %s2483_s25, 4  ;;  %p3005_p3 = scmp.eq.s32.totalorder %s2533_s24, 0  ;;  %s203_s0 = int_to_ptr.vmem [resolvable:$true] %s202_s0 }
   0x7   : > { %p2537_p2 = pnand %p1913_p0, %p181_p1  ;;  %s2443_s30 = scalar_lea.hbm %s3002_s4, 2304 }
   0x8   : > { %p2444_p6 = scmp.ne.s32.totalorder %s3002_s4, %s2443_s30  ;;  %p2450_p10 = scmp.lt.u32.totalorder %s2443_s30, %s3002_s4 }
   0x9   : > { %s3007_s26 = scalar_select %p2537_p2, 1, 0 }
   0xa   : > { %p2383_p4 = pneg %p2537_p2 }
   0xc   : > { %p2546_p5 = pnand %p3005_p3, %p2383_p4 }
   0xe   : > { %p2445_p7 = pneg %p2546_p5 }
  0x10   : > { %p2446_p8 = pnand %p2445_p7, %p2444_p6 }
  0x12   : > { %p2447_p9 = pneg %p2446_p8 }
  0x14   : > { %p2452_p11 = pnand %p2450_p10, %p2447_p9 }
  0x16   : > { %2455 = shalt.err (!%p2452_p11)
}
  0x17   : > { %s2456_s11 = scalar_lea.vmem %s203_s0, 2304  ;;  %p2464_p1 = scmp.lt.s32.totalorder %s203_s0, %s203_s0 }
  0x18   : > { %p2457_p12 = scmp.ne.s32.totalorder %s203_s0, %s2456_s11  ;;  %p2465_p4 = scmp.lt.s32.totalorder %s2456_s11, %s2456_s11 }
  0x1a   : > { %p2459_p13 = pnand %p2457_p12, %p2445_p7  ;;  %p2466_p3 = por %p2465_p4, %p2464_p1 }
  0x1c   : > { %p2460_p0 = pneg %p2459_p13 }
  0x1e   : > { %p2467_p2 = pnand %p2466_p3, %p2460_p0 }
  0x20   : > { %2470 = shalt.err (!%p2467_p2)
}
  0x21   : > { %s2484_s12 = smov 64   ;;  %s2485_s13 = smov 4  }
  0x22   : > { %2386 = dma.hbm_to_vmem [thread:$0]  (!%p2546_p5), %s3002_s4, 2304, %s203_s0, [#allocation5], %s2484_s12, %s2484_s12, %s2485_s13  }
  0x23   : > { %p3009_p6 = scmp.ne.s32.totalorder %s3007_s26, 0 }
  0x24   : > { %p3010_p8 = scmp.eq.s32.totalorder (!%p3009_p6), %s2533_s24, 0 }
  0x25   : > { %229 = sbr.rel (%p3009_p6) target bundleno = 827 (0x33b), region = 44 }
  0x2c   : > { %2476 = dma.done.wait (%p3010_p8), [#allocation5], 2304   ;;  %p3011_p7 = pmov %p3010_p8 }
  0x2d   : > { %p259_p2 = scmp.lt.s32.totalorder %s2533_s24, 1  ;;  %v2486_v1 = vmov 0.0   ;;  %vm2487_vm0 = vmmov 0   ;;  %v2404_v2 = vld [vmem:[%s3000_s2 + $0x8] sm:$0xff]   ;;  %vm315_vm1 = vsmask.f32 7424 }
  0x2e   : > { %2478 = vsyncadd (%p3011_p7), [#allocation5], 4294964992  ;;  %2086 = vmatprep.subr.bf16.mxu0 %v2486_v1  ;;  %2088 = vmatprep.mubr.msk.bf16.mxu0 %vm2487_vm0, %v2486_v1  ;;  %vm366_vm2 = vcmask 130048   ;;  %v2408_v25 = vld [vmem:[%s3000_s2] sm:$0xff]   ;;  %v1967_v50 = vld [vmem:[#allocation3] ss:$0 sm:$0xff] }
  0x2f   : > { %s3013_s24 = smov (!%p259_p2, %s2533_s24), 1  ;;  %2174 = vmatprep.subr.bf16.mxu1 %v2486_v1  ;;  %2178 = vmatprep.mubr.msk.bf16.mxu1 %vm2487_vm0, %v2486_v1  ;;  %v2488_v53 = vmov 0   ;;  %v2413_v55 = vld [vmem:[%s3000_s2 + $0x10] sm:$0xff]   ;;  %v2414_v56 = vld [vmem:[%s3000_s2 + $0x18] sm:$0xff]   ;;  %vm900_vm3 = vcmask 261120   ;;  %vm1110_vm4 = vcmask 1046528  }
  0x30   : > { %s2378_s16 = smul.u32 48, %s3013_s24  ;;  %2087 = vmatpush3.bf16.msra.mxu0 %v2404_v2  ;;  %2403 = vset.pattern.permute.xlu0 %v2488_v53  ;;  %vm1309_vm5 = vsmask.f32 3328  ;;  %vm1211_vm6 = vcmask 1043456   ;;  %vm1427_vm7 = vcmask 1042432  }
  0x31   : > { %2108 = vmatprep.subr.bf16.mxu0 %v2486_v1  ;;  %855 = vperm.xlu0 %2403, %v1967_v50  }
  0x32   : > { %s2588_s19 = scalar_lea.vmem %s2999_s1, %s2378_s16  ;;  %s268_s11 = scalar_lea.vmem %s3004_s6, %s2378_s16 }
  0x33   : > { %v271_v3 = vld [vmem:[%s2588_s19] sm:$0xf]  ;;  %v2595_v4 = vld [vmem:[%s2588_s19 + $0x4] sm:$0xf]  ;;  %v2598_v5 = vld [vmem:[%s2588_s19 + $0x8] sm:$0xf] }
  0x34   : > { %v2601_v6 = vld [vmem:[%s2588_s19 + $0xc] sm:$0xf]  ;;  %v2604_v7 = vcombine.low %v271_v3, %v2595_v4  ;;  %v1942_v8 = vcombine.low %v2595_v4, %v2598_v5  ;;  %v2614_v10 = vld [vmem:[%s2588_s19 + $0x10] sm:$0xf]  ;;  %v2617_v11 = vld [vmem:[%s2588_s19 + $0x14] sm:$0xf] }
  0x35   : > { %v2611_v9 = vcombine.low %v2598_v5, %v2601_v6  ;;  %v2623_v14 = vcombine.low %v2614_v10, %v2617_v11  ;;  %v2626_v15 = vld [vmem:[%s2588_s19 + $0x18] sm:$0xf]  ;;  %v1943_v16 = vcombine.low %v2601_v6, %v2614_v10  ;;  %v2632_v18 = vld [vmem:[%s2588_s19 + $0x1c] sm:$0xf]  ;;  %v2637_v21 = vld [vmem:[%s2588_s19 + $0x20] sm:$0xf] }
  0x36   : > { %v317_v12 = vshrl.u32 %v2604_v7, 16  ;;  %v319_v13 = vshll.u32 %v2604_v7, 16  ;;  %v1944_v19 = vcombine.low %v2617_v11, %v2626_v15  ;;  %v1945_v23 = vcombine.low %v2632_v18, %v2637_v21  ;;  %v2648_v29 = vld [vmem:[%s2588_s19 + $0x24] sm:$0xf]  ;;  %v2651_v30 = vld [vmem:[%s2588_s19 + $0x28] sm:$0xf] }
  0x37   : > { %v324_v17 = vshll.u32 %v2611_v9, 16  ;;  %v328_v26 = vshrl.u32 %v2611_v9, 16  ;;  %v332_v27 = vshll.u32 %v2623_v14, 16  ;;  %v1925_v31 = vcombine.low %v2626_v15, %v2632_v18  ;;  %v2412_v46 = vld [vmem:[%s2588_s19 + $0x28] ss:$0 sps:$4 sm:$0x11]  }
  0x38   : > { %v321_v20 = vrot.slane %v319_v13, 1  ;;  %v1946_v32 = vcombine.low %v2648_v29, %v2651_v30  ;;  %v336_v35 = vshrl.u32 %v2623_v14, 16  ;;  %v1926_v40 = vcombine.low %v2637_v21, %v2648_v29  ;;  %v2419_v57 = vld [vmem:[%s2588_s19 + $0x4] sm:$0xff]   ;;  %v2420_v58 = vld [vmem:[%s2588_s19 + $0xc] sm:$0xff]   ;;  %v2421_v2 = vld [vmem:[%s2588_s19 + $0x14] sm:$0xff]  }
  0x39   : > { %v326_v22 = vrot.slane %v324_v17, 1  ;;  %v334_v34 = vrot.slane %v332_v27, 1  ;;  %v340_v36 = vshll.u32 %v1925_v31, 16  ;;  %v344_v42 = vshrl.u32 %v1925_v31, 16  ;;  %v2425_v27 = vld [vmem:[#allocation4 + $0x10] sm:$0xff]   ;;  %v2429_v30 = vld [vmem:[#allocation4 + $0x78] sm:$0xff]  }
  0x3a   : > { %v322_v24 = vor.u32 %v321_v20, %v317_v12  ;;  %v348_v43 = vshll.u32 %v1926_v40, 16  ;;  %v352_v48 = vshrl.u32 %v1926_v40, 16  ;;  %v356_v49 = vshll.u32 %v2412_v46, 16  ;;  %v2424_v20 = vld [vmem:[%s2588_s19 + $0x2c] ss:$0 sps:$4 sm:$0x11]   ;;  %2175 = vmatpush3.bf16.msra.mxu1 %v2425_v27 }
  0x3b   : > { %v330_v33 = vor.u32 %v328_v26, %v326_v22  ;;  %v338_v38 = vor.u32 %v336_v35, %v334_v34  ;;  %v342_v39 = vrot.slane %v340_v36, 1  ;;  %v704_v59 = vshll.u32 %v2419_v57, 16  ;;  %2176 = vmatprep.subr.bf16.mxu1 %v2486_v1  ;;  %v2428_v29 = vld [vmem:[#allocation4 + $0x70] sm:$0xff]  }
  0x3c   : > { %v327_v28 = vsel %vm315_vm1, %v322_v24, %v326_v22  ;;  %v350_v45 = vrot.slane %v348_v43, 1  ;;  %v358_v52 = vrot.slane %v356_v49, 1  ;;  %v702_v60 = vshrl.u32 %v2419_v57, 16 }
  0x3d   : > { %2089 = vmatmul.mubr.msk.bf16.vlgmr.msra.gmra.mrb[0].mxu0 %vm366_vm2, %v327_v28  ;;  %v335_v37 = vsel %vm315_vm1, %v330_v33, %v334_v34  ;;  %v343_v41 = vsel %vm315_vm1, %v338_v38, %v342_v39  ;;  %v346_v44 = vor.u32 %v344_v42, %v342_v39  ;;  %v706_v61 = vrot.slane %v704_v59, 1  ;;  %v2426_v28 = vld [vmem:[#allocation4 + $0x18] sm:$0xff]   ;;  %v2771_v33 = vld [vmem:[%s3001_s3] ss:$0 sm:$0xff] }
  0x3e   : > { %2109 = vmatpush3.bf16.msra.mxu0 %v2408_v25  ;;  %2092 = vmatprep.mubr.msk.bf16.mxu0 %vm2487_vm0, %v2486_v1  ;;  %v354_v51 = vor.u32 %v352_v48, %v350_v45  ;;  %v709_v62 = vshll.u32 %v2420_v58, 16  ;;  %v713_v4 = vshrl.u32 %v2420_v58, 16  ;;  %v717_v5 = vshll.u32 %v2421_v2, 16 }
  0x3f   : > { %2130 = vmatprep.subr.bf16.mxu0 %v2486_v1  ;;  %v351_v47 = vsel %vm315_vm1, %v346_v44, %v350_v45  ;;  %v707_v63 = vor.u32 %v706_v61, %v702_v60  ;;  %v721_v10 = vshrl.u32 %v2421_v2, 16  ;;  %2177 = vmatpush3.bf16.msra.mxu1 %v2426_v28 }
  0x40   : > { %v359_v54 = vsel %vm315_vm1, %v354_v51, %v358_v52  ;;  %v711_v0 = vrot.slane %v709_v62, 1  ;;  %2190 = vmatprep.subr.bf16.mxu1 %v2486_v1 }
  0x42   : > { %v712_v3 = vsel %vm315_vm1, %v707_v63, %v711_v0  ;;  %v715_v6 = vor.u32 %v713_v4, %v711_v0 }
  0x45   : > { %2093 = vmatmul.mubr.msk.bf16.gmra.mrb[4].mxu0 %vm366_vm2, %v335_v37 }
  0x46   : > { %2096 = vmatprep.mubr.msk.bf16.mxu0 %vm2487_vm0, %v2486_v1 }
  0x4d   : > { %2097 = vmatmul.mubr.msk.bf16.gmra.mrb[8].mxu0 %vm366_vm2, %v343_v41 }
  0x4e   : > { %2100 = vmatprep.mubr.msk.bf16.mxu0 %vm2487_vm0, %v2486_v1 }
  0x55   : > { %2101 = vmatmul.mubr.msk.bf16.gmra.mrb[12].mxu0 %vm366_vm2, %v351_v47 }
  0x56   : > { %2104 = vmatprep.mubr.msk.bf16.mxu0 %vm2487_vm0, %v2486_v1 }
  0x5d   : > { %2105 = vmatmul.mubr.msk.bf16.gmra.mrb[16].mxu0 %vm366_vm2, %v359_v54 }
  0x5e   : > { %2110 = vmatprep.mubr.msk.bf16.mxu0 %vm2487_vm0, %v2486_v1 }
  0x65   : > { %2111 = vmatmul.mubr.msk.bf16.vlgmr.msra.gmra.mrb[0].mxu0 %vm366_vm2, %v2604_v7  ;;  %v719_v7 = vrot.slane %v717_v5, 1 }
  0x66   : > { %2131 = vmatpush3.bf16.msra.mxu0 %v2413_v55  ;;  %2114 = vmatprep.mubr.msk.bf16.mxu0 %vm2487_vm0, %v2486_v1 }
  0x67   : > { %2152 = vmatprep.subr.bf16.mxu0 %v2486_v1  ;;  %v723_v12 = vor.u32 %v721_v10, %v719_v7 }
  0x6d   : > { %2115 = vmatmul.mubr.msk.bf16.gmra.mrb[4].mxu0 %vm366_vm2, %v2611_v9  ;;  %v720_v9 = vsel %vm315_vm1, %v715_v6, %v719_v7 }
  0x6e   : > { %2118 = vmatprep.mubr.msk.bf16.mxu0 %vm2487_vm0, %v2486_v1 }
  0x75   : > { %2119 = vmatmul.mubr.msk.bf16.gmra.mrb[8].mxu0 %vm366_vm2, %v2623_v14  ;;  %v2423_v14 = vld [vmem:[%s2588_s19 + $0x24] sm:$0xff]  }
  0x76   : > { %2122 = vmatprep.mubr.msk.bf16.mxu0 %vm2487_vm0, %v2486_v1  ;;  %v733_v17 = vshll.u32 %v2423_v14, 16  ;;  %v737_v22 = vshrl.u32 %v2423_v14, 16 }
  0x7d   : > { %2123 = vmatmul.mubr.msk.bf16.gmra.mrb[12].mxu0 %vm366_vm2, %v1925_v31 }
  0x7e   : > { %2126 = vmatprep.mubr.msk.bf16.mxu0 %vm2487_vm0, %v2486_v1 }
  0x85   : > { %2127 = vmatmul.mubr.msk.bf16.gmra.mrb[16].mxu0 %vm366_vm2, %v1926_v40 }
  0x86   : > { %2132 = vmatprep.mubr.msk.bf16.mxu0 %vm2487_vm0, %v2486_v1 }
  0x8d   : > { %2133 = vmatmul.mubr.msk.bf16.vlgmr.msra.gmra.mrb[0].mxu0 %vm366_vm2, %v1942_v8  ;;  %v2422_v8 = vld [vmem:[%s2588_s19 + $0x1c] sm:$0xff]  }
  0x8e   : > { %2153 = vmatpush3.bf16.msra.mxu0 %v2414_v56  ;;  %2136 = vmatprep.mubr.msk.bf16.mxu0 %vm2487_vm0, %v2486_v1  ;;  %v725_v11 = vshll.u32 %v2422_v8, 16 }
  0x8f   : > { %2286 = vmatprep.subr.bf16.mxu0 %v2486_v1 }
  0x90   : > { %v727_v13 = vrot.slane %v725_v11, 1 }
  0x92   : > { %v728_v15 = vsel %vm315_vm1, %v723_v12, %v727_v13 }
  0x95   : > { %2137 = vmatmul.mubr.msk.bf16.gmra.mrb[4].mxu0 %vm366_vm2, %v1943_v16  ;;  %v729_v16 = vshrl.u32 %v2422_v8, 16 }
  0x96   : > { %2140 = vmatprep.mubr.msk.bf16.mxu0 %vm2487_vm0, %v2486_v1 }
  0x97   : > { %v731_v18 = vor.u32 %v729_v16, %v727_v13 }
  0x9d   : > { %2141 = vmatmul.mubr.msk.bf16.gmra.mrb[8].mxu0 %vm366_vm2, %v1944_v19  ;;  %v735_v19 = vrot.slane %v733_v17, 1 }
  0x9e   : > { %2144 = vmatprep.mubr.msk.bf16.mxu0 %vm2487_vm0, %v2486_v1 }
  0x9f   : > { %v736_v21 = vsel %vm315_vm1, %v731_v18, %v735_v19  ;;  %v739_v24 = vor.u32 %v737_v22, %v735_v19 }
  0xa5   : > { %2145 = vmatmul.mubr.msk.bf16.gmra.mrb[12].mxu0 %vm366_vm2, %v1945_v23  ;;  %v741_v23 = vshll.u32 %v2424_v20, 16 }
  0xa6   : > { %2148 = vmatprep.mubr.msk.bf16.mxu0 %vm2487_vm0, %v2486_v1 }
  0xa7   : > { %v743_v25 = vrot.slane %v741_v23, 1 }
  0xa9   : > { %v744_v26 = vsel %vm315_vm1, %v739_v24, %v743_v25 }
  0xad   : > { %2149 = vmatmul.mubr.msk.bf16.gmra.mrb[16].mxu0 %vm366_vm2, %v1946_v32 }
  0xae   : > { %2154 = vmatprep.mubr.msk.bf16.mxu0 %vm2487_vm0, %v2486_v1 }
  0xb0   : > { %v2766_v31 = vpop.permute.xlu0 %855 }
  0xb5   : > { %2155 = vmatmul.mubr.msk.bf16.vlgmr.msra.gmra.mrb[0].mxu0 %vm366_vm2, %v712_v3 }
  0xb6   : > { %2158 = vmatprep.mubr.msk.bf16.mxu0 %vm2487_vm0, %v2486_v1  ;;  %2287 = vmatpush3.bf16.msra.mxu0 %v2428_v29 }
  0xb7   : > { %2288 = vmatprep.subr.bf16.mxu0 %v2486_v1 }
  0xba   : > { %2289 = vmatpush3.bf16.msra.mxu0 %v2429_v30 }
  0xbd   : > { %2159 = vmatmul.mubr.msk.bf16.gmra.mrb[4].mxu0 %vm366_vm2, %v720_v9 }
  0xbe   : > { %2162 = vmatprep.mubr.msk.bf16.mxu0 %vm2487_vm0, %v2486_v1 }
  0xc5   : > { %2163 = vmatmul.mubr.msk.bf16.gmra.mrb[8].mxu0 %vm366_vm2, %v728_v15 }
  0xc6   : > { %2166 = vmatprep.mubr.msk.bf16.mxu0 %vm2487_vm0, %v2486_v1 }
  0xcd   : > { %2167 = vmatmul.mubr.msk.bf16.gmra.mrb[12].mxu0 %vm366_vm2, %v736_v21  ;;  %v2427_v21 = vld [vmem:[#allocation4] sm:$0xff]  }
  0xce   : > { %2170 = vmatprep.mubr.msk.bf16.mxu0 %vm2487_vm0, %v2486_v1 }
  0xd5   : > { %2171 = vmatmul.mubr.msk.bf16.gmra.mrb[16].mxu0 %vm366_vm2, %v744_v26 }
  0xd6   : > { %2290 = vmatprep.mubr.msk.bf16.mxu0 %vm2487_vm0, %v2486_v1 }
 0x188   : > { %v800_v32 = vpop.f32.mrb[0].mxu0 }
 0x189   : > { %v2156_v34 = vpop.f32.mrb[1].mxu0  ;;  %v858_v35 = vmul.f32 %v2766_v31, %v800_v32  ;;  %v2430_v32 = vld [vmem:[#allocation4 + $0x8] sm:$0xff]  }
 0x18a   : > { %v803_v36 = vpop.f32.mrb[2].mxu0 }
 0x18b   : > { %v859_v37 = vmul.f32 %v2766_v31, %v803_v36  ;;  %v875_v38 = vadd.f32 %v2771_v33, %v858_v35  ;;  %v2157_v39 = vpop.f32.mrb[3].mxu0 }
 0x18d   : > { %v876_v40 = vadd.f32 %v2771_v33, %v859_v37  ;;  %v885_v41 = vmax.f32 %v875_v38, 0.0 }
 0x18f   : > { %v886_v42 = vmax.f32 %v876_v40, 0.0 }
 0x190   : > { %v808_v43 = vpop.f32.mrb[4].mxu0 }
 0x191   : > { %v895_v44 = vpack.c.bf16 %v886_v42, %v885_v41  ;;  %v860_v45 = vmul.f32 %v2766_v31, %v808_v43  ;;  %v2160_v46 = vpop.f32.mrb[5].mxu0 }
 0x192   : > { %v811_v47 = vpop.f32.mrb[6].mxu0 }
 0x193   : > { %901 = vst.msk [vmem:[#allocation2] sm:$0xff] %vm900_vm3, %v895_v44  ;;  %v877_v48 = vadd.f32 %v2771_v33, %v860_v45  ;;  %v861_v49 = vmul.f32 %v2766_v31, %v811_v47  ;;  %v2161_v50 = vpop.f32.mrb[7].mxu0 }
 0x195   : > { %v878_v51 = vadd.f32 %v2771_v33, %v861_v49  ;;  %v887_v52 = vmax.f32 %v877_v48, 0.0 }
 0x197   : > { %v888_v53 = vmax.f32 %v878_v51, 0.0 }
 0x198   : > { %v816_v54 = vpop.f32.mrb[8].mxu0 }
 0x199   : > { %v896_v55 = vpack.c.bf16 %v888_v53, %v887_v52  ;;  %v862_v56 = vmul.f32 %v2766_v31, %v816_v54  ;;  %v2164_v57 = vpop.f32.mrb[9].mxu0 }
 0x19a   : > { %v819_v58 = vpop.f32.mrb[10].mxu0  ;;  %v2783_v59 = vld [vmem:[#allocation2] sm:$0xff] }
 0x19b   : > { %902 = vst.msk [vmem:[#allocation2 + $0x8] sm:$0xff] %vm900_vm3, %v896_v55  ;;  %v879_v60 = vadd.f32 %v2771_v33, %v862_v56  ;;  %v863_v61 = vmul.f32 %v2766_v31, %v819_v58  ;;  %v2165_v62 = vpop.f32.mrb[11].mxu0  ;;  %v922_v0 = vshll.u32 %v2783_v59, 16  ;;  %v920_v11 = vshrl.u32 %v2783_v59, 16 }
 0x19d   : > { %v880_v63 = vadd.f32 %v2771_v33, %v863_v61  ;;  %v889_v2 = vmax.f32 %v879_v60, 0.0  ;;  %v924_v8 = vrot.slane %v922_v0, 1 }
 0x19f   : > { %v890_v3 = vmax.f32 %v880_v63, 0.0  ;;  %v925_v18 = vor.u32 %v924_v8, %v920_v11 }
 0x1a0   : > { %v824_v4 = vpop.f32.mrb[12].mxu0 }
 0x1a1   : > { %v897_v5 = vpack.c.bf16 %v890_v3, %v889_v2  ;;  %v864_v6 = vmul.f32 %v2766_v31, %v824_v4  ;;  %v2168_v7 = vpop.f32.mrb[13].mxu0 }
 0x1a2   : > { %v827_v9 = vpop.f32.mrb[14].mxu0  ;;  %v2791_v10 = vld [vmem:[#allocation2 + $0x8] sm:$0xff] }
 0x1a3   : > { %903 = vst.msk [vmem:[#allocation2 + $0x10] sm:$0xff] %vm900_vm3, %v897_v5  ;;  %v881_v12 = vadd.f32 %v2771_v33, %v864_v6  ;;  %v865_v13 = vmul.f32 %v2766_v31, %v827_v9  ;;  %v2169_v14 = vpop.f32.mrb[15].mxu0  ;;  %v927_v15 = vshll.u32 %v2791_v10, 16  ;;  %v931_v16 = vshrl.u32 %v2791_v10, 16  ;;  %v1724_v41 = vld [vmem:[#allocation2 + $0x8] sm:$0xfe] }
 0x1a4   : > { %v2431_v7 = vld [vmem:[#allocation4 + $0x20] sm:$0xff]   ;;  %v1112_v14 = vrot.slane %v2791_v10, 1 }
 0x1a5   : > { %v882_v17 = vadd.f32 %v2771_v33, %v865_v13  ;;  %v929_v19 = vrot.slane %v927_v15, 1  ;;  %v1319_v20 = vrot.slane %v927_v15, 5  ;;  %v1318_v22 = vrot.slane %v931_v16, 4  ;;  %v2432_v13 = vld [vmem:[#allocation4 + $0x28] sm:$0xff]  }
 0x1a6   : > { %v891_v23 = vmax.f32 %v881_v12, 0.0 }
 0x1a7   : > { %v892_v24 = vmax.f32 %v882_v17, 0.0  ;;  %v930_v25 = vsel %vm315_vm1, %v925_v18, %v929_v19  ;;  %v2802_v27 = vor.u32 %v1319_v20, %v1318_v22  ;;  %v933_v42 = vor.u32 %v931_v16, %v929_v19  ;;  %v2433_v16 = vld [vmem:[#allocation4 + $0x30] sm:$0xff]   ;;  %v2434_v18 = vld [vmem:[#allocation4 + $0x38] sm:$0xff]  }
 0x1a8   : > { %v832_v26 = vpop.f32.mrb[16].mxu0  ;;  %2179 = vmatmul.mubr.msk.bf16.vlgmr.msra.gmra.mrb[0].mxu1 %vm900_vm3, %v930_v25  ;;  %v1202_v22 = vld [vmem:[#allocation2] sm:$0xf0]  ;;  %v2435_v25 = vld [vmem:[#allocation4 + $0x40] sm:$0xff]  }
 0x1a9   : > { %v898_v28 = vpack.c.bf16 %v892_v24, %v891_v23  ;;  %v866_v29 = vmul.f32 %v2766_v31, %v832_v26  ;;  %2191 = vmatpush3.bf16.msra.mxu1 %v2427_v21  ;;  %v2172_v30 = vpop.f32.mrb[17].mxu0  ;;  %2182 = vmatprep.mubr.msk.bf16.mxu1 %vm2487_vm0, %v2486_v1  ;;  %v1213_v23 = vrot.slane %v2791_v10, 4  ;;  %v1212_v24 = vrot.slane %v1202_v22, 4 }
 0x1aa   : > { %v835_v34 = vpop.f32.mrb[18].mxu0  ;;  %v2807_v35 = vld [vmem:[#allocation2 + $0x10] sm:$0xff]  ;;  %2192 = vmatprep.subr.bf16.mxu1 %v2486_v1 }
 0x1ab   : > { %904 = vst.msk [vmem:[#allocation2 + $0x18] sm:$0xff] %vm900_vm3, %v898_v28  ;;  %v883_v36 = vadd.f32 %v2771_v33, %v866_v29  ;;  %v867_v37 = vmul.f32 %v2766_v31, %v835_v34  ;;  %v2173_v38 = vpop.f32.mrb[19].mxu0  ;;  %v935_v39 = vshll.u32 %v2807_v35, 16  ;;  %v939_v40 = vshrl.u32 %v2807_v35, 16  ;;  %v2436_v28 = vld [vmem:[#allocation4 + $0x48] sm:$0xff]  }
 0x1ac   : > { %v2816_v43 = vrot.slane %v2807_v35, 1  ;;  %v1734_v31 = vrot.slane %v1724_v41, 1  ;;  %v1214_v26 = vsel %vm1211_vm6, %v1212_v24, %v1213_v23  ;;  %v1215_v29 = vrot.slane %v2807_v35, 4 }
 0x1ad   : > { %v884_v44 = vadd.f32 %v2771_v33, %v867_v37  ;;  %v937_v45 = vrot.slane %v935_v39, 1  ;;  %2193 = vmatpush3.bf16.msra.mxu1 %v2430_v32  ;;  %v1322_v46 = vrot.slane %v939_v40, 4  ;;  %v1323_v47 = vrot.slane %v935_v39, 5 }
 0x1ae   : > { %2206 = vmatprep.subr.bf16.mxu1 %v2486_v1  ;;  %v893_v48 = vmax.f32 %v883_v36, 0.0  ;;  %v2827_v33 = vsel %vm1110_vm4, %v1734_v31, %v2816_v43  ;;  %v1115_v19 = vsel %vm1110_vm4, %v1112_v14, %v2816_v43  ;;  %v1216_v30 = vsel %vm1211_vm6, %v1213_v23, %v1215_v29 }
 0x1af   : > { %v894_v49 = vmax.f32 %v884_v44, 0.0  ;;  %v938_v50 = vsel %vm315_vm1, %v933_v42, %v937_v45  ;;  %v2823_v51 = vor.u32 %v1323_v47, %v1322_v46  ;;  %v941_v58 = vor.u32 %v939_v40, %v937_v45  ;;  %v2437_v42 = vld [vmem:[#allocation4 + $0x50] sm:$0xff]   ;;  %v2438_v45 = vld [vmem:[#allocation4 + $0x58] sm:$0xff]  }
 0x1b0   : > { %2183 = vmatmul.mubr.msk.bf16.gmra.mrb[4].mxu1 %vm900_vm3, %v938_v50  ;;  %2291 = vmatmul.mubr.msk.bf16.vlgmr.msra.gmra.mrb[20].mxu0 %vm900_vm3, %v938_v50  ;;  %v1311_v36 = vshrl.u32 %v1202_v22, 16  ;;  %v1314_v37 = vshll.u32 %v1202_v22, 16  ;;  %v1419_v50 = vld [vmem:[#allocation2] sm:$0xe0] }
 0x1b1   : > { %v899_v52 = vpack.c.bf16 %v894_v49, %v893_v48  ;;  %2186 = vmatprep.mubr.msk.bf16.mxu1 %vm2487_vm0, %v2486_v1  ;;  %2294 = vmatprep.mubr.msk.bf16.mxu0 %vm2487_vm0, %v2486_v1  ;;  %v2838_v55 = vsel %vm1309_vm5, %v2802_v27, %v2823_v51 }
 0x1b2   : > { %v913_v53 = vld [vmem:[#allocation2 + $0x18] sm:$0x1]  ;;  %v1313_v39 = vrot.slane %v1311_v36, 4  ;;  %v1316_v40 = vrot.slane %v1314_v37, 5 }
 0x1b3   : > { %v2833_v54 = vld [vmem:[#allocation2 + $0x18] sm:$0xff]  ;;  %905 = vst.msk [vmem:[#allocation2 + $0x20] sm:$0xff] %vm900_vm3, %v899_v52  ;;  %v943_v56 = vshll.u32 %v913_v53, 16  ;;  %v1116_v20 = vrot.slane %v913_v53, 1  ;;  %v1429_v52 = vrot.slane %v2791_v10, 5  ;;  %v1428_v53 = vrot.slane %v1419_v50, 5 }
 0x1b4   : > { %v1628_v57 = vshll.u32 %v2833_v54, 16  ;;  %v1737_v62 = vrot.slane %v2833_v54, 1  ;;  %v1632_v4 = vshrl.u32 %v2833_v54, 16  ;;  %v1203_v32 = vld [vmem:[#allocation2 + $0x18] sm:$0xf]  ;;  %v1317_v41 = vor.u32 %v1316_v40, %v1313_v39 }
 0x1b5   : > { %v945_v60 = vrot.slane %v943_v56, 1  ;;  %v1117_v21 = vsel %vm1110_vm4, %v2816_v43, %v1116_v20  ;;  %v1217_v34 = vrot.slane %v1203_v32, 4  ;;  %v1303_v44 = vld [vmem:[#allocation2 + $0x18] sm:$0x1f]  ;;  %v2439_v56 = vld [vmem:[#allocation4 + $0x60] sm:$0xff]  }
 0x1b6   : > { %v1630_v61 = vrot.slane %v1628_v57, 1  ;;  %v2847_v2 = vsel %vm1110_vm4, %v2816_v43, %v1737_v62  ;;  %v1321_v43 = vsel %vm1309_vm5, %v1317_v41, %v2802_v27  ;;  %v1327_v46 = vshrl.u32 %v1303_v44, 16 }
 0x1b7   : > { %v946_v63 = vsel %vm315_vm1, %v941_v58, %v945_v60  ;;  %v1218_v38 = vsel %vm1211_vm6, %v1215_v29, %v1217_v34  ;;  %v1330_v47 = vshll.u32 %v1303_v44, 16  ;;  %v1431_v57 = vrot.slane %v2807_v35, 5 }
 0x1b8   : > { %v1631_v0 = vsel %vm315_vm1, %v941_v58, %v1630_v61  ;;  %2187 = vmatmul.mubr.msk.bf16.gmra.mrb[8].mxu1 %vm900_vm3, %v946_v63  ;;  %v1634_v8 = vor.u32 %v1632_v4, %v1630_v61  ;;  %v1329_v31 = vrot.slane %v1327_v46, 4  ;;  %v1433_v60 = vrot.slane %v1303_v44, 5  ;;  %v2442_v63 = vld [vmem:[#allocation4 + $0x88] sm:$0xff]  }
 0x1b9   : > { %2295 = vmatmul.mubr.msk.bf16.gmra.mrb[24].mxu0 %vm900_vm3, %v1631_v0  ;;  %2194 = vmatprep.mubr.msk.bf16.mxu1 %vm2487_vm0, %v2486_v1  ;;  %v1332_v48 = vrot.slane %v1330_v47, 5  ;;  %v1432_v58 = vsel %vm1427_vm7, %v1429_v52, %v1431_v57 }
 0x1ba   : > { %2298 = vmatprep.mubr.msk.bf16.mxu0 %vm2487_vm0, %v2486_v1  ;;  %v1606_v3 = vld [vmem:[#allocation2 + $0x20] sm:$0x1]  ;;  %v1434_v61 = vsel %vm1427_vm7, %v1431_v57, %v1433_v60 }
 0x1bb   : > { %v1636_v5 = vshll.u32 %v1606_v3, 16  ;;  %v1739_v6 = vrot.slane %v1606_v3, 1  ;;  %v1333_v27 = vor.u32 %v1332_v48, %v1329_v31 }
 0x1bd   : > { %v1638_v9 = vrot.slane %v1636_v5, 1  ;;  %v2857_v11 = vsel %vm1110_vm4, %v1737_v62, %v1739_v6  ;;  %v1334_v49 = vsel %vm1309_vm5, %v2823_v51, %v1333_v27  ;;  %v2440_v51 = vld [vmem:[#allocation4 + $0x68] sm:$0xff]   ;;  %v2441_v62 = vld [vmem:[#allocation4 + $0x80] sm:$0xff]  }
 0x1bf   : > { %v1639_v12 = vsel %vm315_vm1, %v1634_v8, %v1638_v9 }
 0x1c0   : > { %2195 = vmatmul.mubr.msk.bf16.vlgmr.msra.gmra.mrb[12].mxu1 %vm900_vm3, %v2783_v59  ;;  %v1100_v59 = vld [vmem:[#allocation2] sm:$0xfe] }
 0x1c1   : > { %2299 = vmatmul.mubr.msk.bf16.gmra.mrb[28].mxu0 %vm900_vm3, %v1639_v12  ;;  %2207 = vmatpush3.bf16.msra.mxu1 %v2431_v7  ;;  %v1111_v15 = vrot.slane %v1100_v59, 1 }
 0x1c2   : > { %2198 = vmatprep.mubr.msk.bf16.mxu1 %vm2487_vm0, %v2486_v1  ;;  %2208 = vmatprep.subr.bf16.mxu1 %v2486_v1 }
 0x1c3   : > { %v1113_v17 = vsel %vm1110_vm4, %v1111_v15, %v1112_v14 }
 0x1c5   : > { %2209 = vmatpush3.bf16.msra.mxu1 %v2432_v13 }
 0x1c6   : > { %2222 = vmatprep.subr.bf16.mxu1 %v2486_v1 }
 0x1c8   : > { %2199 = vmatmul.mubr.msk.bf16.gmra.mrb[16].mxu1 %vm900_vm3, %v2791_v10 }
 0x1c9   : > { %2202 = vmatprep.mubr.msk.bf16.mxu1 %vm2487_vm0, %v2486_v1 }
 0x1d0   : > { %2203 = vmatmul.mubr.msk.bf16.gmra.mrb[20].mxu1 %vm900_vm3, %v2807_v35 }
 0x1d1   : > { %2210 = vmatprep.mubr.msk.bf16.mxu1 %vm2487_vm0, %v2486_v1 }
 0x1d8   : > { %2211 = vmatmul.mubr.msk.bf16.vlgmr.msra.gmra.mrb[24].mxu1 %vm900_vm3, %v1113_v17 }
 0x1d9   : > { %2223 = vmatpush3.bf16.msra.mxu1 %v2433_v16  ;;  %2214 = vmatprep.mubr.msk.bf16.mxu1 %vm2487_vm0, %v2486_v1 }
 0x1da   : > { %2224 = vmatprep.subr.bf16.mxu1 %v2486_v1 }
 0x1dd   : > { %2225 = vmatpush3.bf16.msra.mxu1 %v2434_v18 }
 0x1de   : > { %2238 = vmatprep.subr.bf16.mxu1 %v2486_v1 }
 0x1e0   : > { %2215 = vmatmul.mubr.msk.bf16.gmra.mrb[28].mxu1 %vm900_vm3, %v1115_v19 }
 0x1e1   : > { %2218 = vmatprep.mubr.msk.bf16.mxu1 %vm2487_vm0, %v2486_v1 }
 0x1e8   : > { %2219 = vmatmul.mubr.msk.bf16.gmra.mrb[32].mxu1 %vm900_vm3, %v1117_v21 }
 0x1e9   : > { %2226 = vmatprep.mubr.msk.bf16.mxu1 %vm2487_vm0, %v2486_v1 }
 0x1f0   : > { %2227 = vmatmul.mubr.msk.bf16.vlgmr.msra.gmra.mrb[36].mxu1 %vm900_vm3, %v1214_v26 }
 0x1f1   : > { %2239 = vmatpush3.bf16.msra.mxu1 %v2435_v25  ;;  %2230 = vmatprep.mubr.msk.bf16.mxu1 %vm2487_vm0, %v2486_v1 }
 0x1f2   : > { %2240 = vmatprep.subr.bf16.mxu1 %v2486_v1 }
 0x1f5   : > { %2241 = vmatpush3.bf16.msra.mxu1 %v2436_v28 }
 0x1f6   : > { %2254 = vmatprep.subr.bf16.mxu1 %v2486_v1 }
 0x1f8   : > { %2231 = vmatmul.mubr.msk.bf16.gmra.mrb[40].mxu1 %vm900_vm3, %v1216_v30 }
 0x1f9   : > { %2234 = vmatprep.mubr.msk.bf16.mxu1 %vm2487_vm0, %v2486_v1 }
 0x200   : > { %2235 = vmatmul.mubr.msk.bf16.gmra.mrb[44].mxu1 %vm900_vm3, %v1218_v38 }
 0x201   : > { %2242 = vmatprep.mubr.msk.bf16.mxu1 %vm2487_vm0, %v2486_v1 }
 0x208   : > { %2243 = vmatmul.mubr.msk.bf16.vlgmr.msra.gmra.mrb[48].mxu1 %vm900_vm3, %v1321_v43 }
 0x209   : > { %2255 = vmatpush3.bf16.msra.mxu1 %v2437_v42  ;;  %2246 = vmatprep.mubr.msk.bf16.mxu1 %vm2487_vm0, %v2486_v1 }
 0x20a   : > { %2256 = vmatprep.subr.bf16.mxu1 %v2486_v1 }
 0x20d   : > { %2257 = vmatpush3.bf16.msra.mxu1 %v2438_v45 }
 0x20e   : > { %2270 = vmatprep.subr.bf16.mxu1 %v2486_v1 }
 0x210   : > { %2247 = vmatmul.mubr.msk.bf16.gmra.mrb[52].mxu1 %vm900_vm3, %v2838_v55  ;;  %v1430_v55 = vsel %vm1427_vm7, %v1428_v53, %v1429_v52 }
 0x211   : > { %2250 = vmatprep.mubr.msk.bf16.mxu1 %vm2487_vm0, %v2486_v1 }
 0x218   : > { %2251 = vmatmul.mubr.msk.bf16.gmra.mrb[56].mxu1 %vm900_vm3, %v1334_v49 }
 0x219   : > { %2258 = vmatprep.mubr.msk.bf16.mxu1 %vm2487_vm0, %v2486_v1 }
 0x220   : > { %2259 = vmatmul.mubr.msk.bf16.vlgmr.msra.gmra.mrb[60].mxu1 %vm900_vm3, %v1430_v55 }
 0x221   : > { %2271 = vmatpush3.bf16.msra.mxu1 %v2439_v56  ;;  %2262 = vmatprep.mubr.msk.bf16.mxu1 %vm2487_vm0, %v2486_v1 }
 0x222   : > { %2272 = vmatprep.subr.bf16.mxu1 %v2486_v1 }
 0x225   : > { %2273 = vmatpush3.bf16.msra.mxu1 %v2440_v51 }
 0x226   : > { %2302 = vmatprep.subr.bf16.mxu1 %v2486_v1 }
 0x228   : > { %2263 = vmatmul.mubr.msk.bf16.gmra.mrb[64].mxu1 %vm900_vm3, %v1432_v58 }
 0x229   : > { %2266 = vmatprep.mubr.msk.bf16.mxu1 %vm2487_vm0, %v2486_v1 }
 0x230   : > { %2267 = vmatmul.mubr.msk.bf16.gmra.mrb[68].mxu1 %vm900_vm3, %v1434_v61 }
 0x231   : > { %2274 = vmatprep.mubr.msk.bf16.mxu1 %vm2487_vm0, %v2486_v1 }
 0x238   : > { %2275 = vmatmul.mubr.msk.bf16.vlgmr.msra.gmra.mrb[72].mxu1 %vm900_vm3, %v2791_v10 }
 0x239   : > { %2303 = vmatpush3.bf16.msra.mxu1 %v2441_v62  ;;  %2278 = vmatprep.mubr.msk.bf16.mxu1 %vm2487_vm0, %v2486_v1 }
 0x23a   : > { %2304 = vmatprep.subr.bf16.mxu1 %v2486_v1 }
 0x23d   : > { %2305 = vmatpush3.bf16.msra.mxu1 %v2442_v63 }
 0x240   : > { %2279 = vmatmul.mubr.msk.bf16.gmra.mrb[76].mxu1 %vm900_vm3, %v2807_v35 }
 0x241   : > { %2282 = vmatprep.mubr.msk.bf16.mxu1 %vm2487_vm0, %v2486_v1 }
 0x248   : > { %2283 = vmatmul.mubr.msk.bf16.gmra.mrb[80].mxu1 %vm900_vm3, %v2833_v54 }
 0x249   : > { %2306 = vmatprep.mubr.msk.bf16.mxu1 %vm2487_vm0, %v2486_v1 }
 0x250   : > { %2307 = vmatmul.mubr.msk.bf16.vlgmr.msra.gmra.mrb[84].mxu1 %vm900_vm3, %v2827_v33 }
 0x251   : > { %2310 = vmatprep.mubr.msk.bf16.mxu1 %vm2487_vm0, %v2486_v1 }
 0x258   : > { %2311 = vmatmul.mubr.msk.bf16.gmra.mrb[88].mxu1 %vm900_vm3, %v2847_v2 }
 0x259   : > { %2314 = vmatprep.mubr.msk.bf16.mxu1 %vm2487_vm0, %v2486_v1 }
 0x260   : > { %2315 = vmatmul.mubr.msk.bf16.gmra.mrb[92].mxu1 %vm900_vm3, %v2857_v11 }
 0x27b   : > { %v1002_v10 = vpop.f32.mrb[0].mxu1 }
 0x27c   : > { %v2180_v35 = vpop.f32.mrb[1].mxu1 }
 0x27d   : > { %v1005_v54 = vpop.f32.mrb[2].mxu1 }
 0x27e   : > { %v2181_v0 = vpop.f32.mrb[3].mxu1 }
 0x283   : > { %v1010_v3 = vpop.f32.mrb[4].mxu1  ;;  %v2963_v4 = vpop.f32.mrb[20].mxu0 }
 0x284   : > { %v2184_v33 = vpop.f32.mrb[5].mxu1  ;;  %v2292_v5 = vpop.f32.mrb[21].mxu0 }
 0x285   : > { %v1013_v6 = vpop.f32.mrb[6].mxu1  ;;  %v2965_v7 = vpop.f32.mrb[22].mxu0 }
 0x286   : > { %v2185_v8 = vpop.f32.mrb[7].mxu1  ;;  %v2293_v2 = vpop.f32.mrb[23].mxu0 }
 0x28b   : > { %v1018_v9 = vpop.f32.mrb[8].mxu1 }
 0x28c   : > { %v2967_v12 = vpop.f32.mrb[24].mxu0  ;;  %v2188_v1 = vpop.f32.mrb[9].mxu1 }
 0x28d   : > { %v2296_v13 = vpop.f32.mrb[25].mxu0  ;;  %v1021_v11 = vpop.f32.mrb[10].mxu1 }
 0x28e   : > { %v2969_v59 = vpop.f32.mrb[26].mxu0  ;;  %v2189_v14 = vpop.f32.mrb[11].mxu1 }
 0x28f   : > { %v2297_v15 = vpop.f32.mrb[27].mxu0 }
 0x293   : > { %v1077_v16 = vpop.f32.mrb[12].mxu1 }
 0x294   : > { %v2971_v17 = vpop.f32.mrb[28].mxu0  ;;  %v1078_v18 = vadd.f32 %v1077_v16, %v1002_v10  ;;  %v2196_v19 = vpop.f32.mrb[13].mxu1 }
 0x295   : > { %v2300_v20 = vpop.f32.mrb[29].mxu0  ;;  %v1080_v21 = vpop.f32.mrb[14].mxu1 }
 0x296   : > { %v2973_v22 = vpop.f32.mrb[30].mxu0  ;;  %v1081_v23 = vadd.f32 %v1080_v21, %v1005_v54  ;;  %v2197_v24 = vpop.f32.mrb[15].mxu1 }
 0x297   : > { %v2301_v25 = vpop.f32.mrb[31].mxu0 }
 0x29b   : > { %v1085_v26 = vpop.f32.mrb[16].mxu1 }
 0x29c   : > { %v1086_v28 = vadd.f32 %v1085_v26, %v1010_v3  ;;  %v2200_v29 = vpop.f32.mrb[17].mxu1 }
 0x29d   : > { %v1088_v30 = vpop.f32.mrb[18].mxu1 }
 0x29e   : > { %v1089_v32 = vadd.f32 %v1088_v30, %v1013_v6  ;;  %v2201_v34 = vpop.f32.mrb[19].mxu1 }
 0x2a3   : > { %v1093_v36 = vpop.f32.mrb[20].mxu1 }
 0x2a4   : > { %v1094_v37 = vadd.f32 %v1093_v36, %v1018_v9  ;;  %v2204_v38 = vpop.f32.mrb[21].mxu1 }
 0x2a5   : > { %v1096_v39 = vpop.f32.mrb[22].mxu1 }
 0x2a6   : > { %v1097_v40 = vadd.f32 %v1096_v39, %v1021_v11  ;;  %v2205_v41 = vpop.f32.mrb[23].mxu1 }
 0x2ab   : > { %v1173_v42 = vpop.f32.mrb[24].mxu1 }
 0x2ac   : > { %v1196_v43 = vadd.f32 %v1173_v42, %v1078_v18  ;;  %v2212_v44 = vpop.f32.mrb[25].mxu1 }
 0x2ad   : > { %v1176_v45 = vpop.f32.mrb[26].mxu1 }
 0x2ae   : > { %v1197_v46 = vadd.f32 %v1176_v45, %v1081_v23  ;;  %v2213_v47 = vpop.f32.mrb[27].mxu1 }
 0x2b3   : > { %v1181_v31 = vpop.f32.mrb[28].mxu1 }
 0x2b4   : > { %v1198_v48 = vadd.f32 %v1181_v31, %v1086_v28  ;;  %v2216_v27 = vpop.f32.mrb[29].mxu1 }
 0x2b5   : > { %v1184_v49 = vpop.f32.mrb[30].mxu1 }
 0x2b6   : > { %v1199_v50 = vadd.f32 %v1184_v49, %v1089_v32  ;;  %v2217_v52 = vpop.f32.mrb[31].mxu1 }
 0x2bb   : > { %v1189_v53 = vpop.f32.mrb[32].mxu1 }
 0x2bc   : > { %v1200_v56 = vadd.f32 %v1189_v53, %v1094_v37  ;;  %v2220_v55 = vpop.f32.mrb[33].mxu1 }
 0x2bd   : > { %v1192_v51 = vpop.f32.mrb[34].mxu1 }
 0x2be   : > { %v1201_v57 = vadd.f32 %v1192_v51, %v1097_v40  ;;  %v2221_v58 = vpop.f32.mrb[35].mxu1 }
 0x2c3   : > { %v1274_v60 = vpop.f32.mrb[36].mxu1 }
 0x2c4   : > { %v1297_v61 = vadd.f32 %v1274_v60, %v1196_v43  ;;  %v2228_v62 = vpop.f32.mrb[37].mxu1 }
 0x2c5   : > { %v1277_v63 = vpop.f32.mrb[38].mxu1 }
 0x2c6   : > { %v1298_v10 = vadd.f32 %v1277_v63, %v1197_v46  ;;  %v2229_v35 = vpop.f32.mrb[39].mxu1 }
 0x2cb   : > { %v1282_v54 = vpop.f32.mrb[40].mxu1 }
 0x2cc   : > { %v1299_v0 = vadd.f32 %v1282_v54, %v1198_v48  ;;  %v2232_v3 = vpop.f32.mrb[41].mxu1 }
 0x2cd   : > { %v1285_v33 = vpop.f32.mrb[42].mxu1 }
 0x2ce   : > { %v1300_v5 = vadd.f32 %v1285_v33, %v1199_v50  ;;  %v2233_v6 = vpop.f32.mrb[43].mxu1 }
 0x2d3   : > { %v1290_v8 = vpop.f32.mrb[44].mxu1 }
 0x2d4   : > { %v1301_v2 = vadd.f32 %v1290_v8, %v1200_v56  ;;  %v2236_v9 = vpop.f32.mrb[45].mxu1 }
 0x2d5   : > { %v1293_v1 = vpop.f32.mrb[46].mxu1 }
 0x2d6   : > { %v1302_v13 = vadd.f32 %v1293_v1, %v1201_v57  ;;  %v2237_v11 = vpop.f32.mrb[47].mxu1 }
 0x2db   : > { %v1390_v14 = vpop.f32.mrb[48].mxu1 }
 0x2dc   : > { %v1413_v15 = vadd.f32 %v1390_v14, %v1297_v61  ;;  %v2244_v16 = vpop.f32.mrb[49].mxu1 }
 0x2dd   : > { %v1393_v18 = vpop.f32.mrb[50].mxu1 }
 0x2de   : > { %v1414_v19 = vadd.f32 %v1393_v18, %v1298_v10  ;;  %v2245_v20 = vpop.f32.mrb[51].mxu1 }
 0x2e3   : > { %v1398_v21 = vpop.f32.mrb[52].mxu1 }
 0x2e4   : > { %v1415_v23 = vadd.f32 %v1398_v21, %v1299_v0  ;;  %v2248_v24 = vpop.f32.mrb[53].mxu1 }
 0x2e5   : > { %v1401_v25 = vpop.f32.mrb[54].mxu1 }
 0x2e6   : > { %v1416_v26 = vadd.f32 %v1401_v25, %v1300_v5  ;;  %v2249_v28 = vpop.f32.mrb[55].mxu1 }
 0x2eb   : > { %v1406_v29 = vpop.f32.mrb[56].mxu1 }
 0x2ec   : > { %v1417_v30 = vadd.f32 %v1406_v29, %v1301_v2  ;;  %v2252_v32 = vpop.f32.mrb[57].mxu1 }
 0x2ed   : > { %v1409_v34 = vpop.f32.mrb[58].mxu1 }
 0x2ee   : > { %v1418_v36 = vadd.f32 %v1409_v34, %v1302_v13  ;;  %v2253_v37 = vpop.f32.mrb[59].mxu1 }
 0x2f3   : > { %v1490_v38 = vpop.f32.mrb[60].mxu1 }
 0x2f4   : > { %v1513_v39 = vadd.f32 %v1490_v38, %v1413_v15  ;;  %v2260_v40 = vpop.f32.mrb[61].mxu1  ;;  %v2014_v15 = vld [vmem:[%s3003_s5] ss:$0 sm:$0xff] }
 0x2f5   : > { %v1493_v41 = vpop.f32.mrb[62].mxu1 }
 0x2f6   : > { %v1514_v42 = vadd.f32 %v1493_v41, %v1414_v19  ;;  %v2261_v43 = vpop.f32.mrb[63].mxu1 }
 0x2fb   : > { %v1498_v44 = vpop.f32.mrb[64].mxu1 }
 0x2fc   : > { %v1515_v45 = vadd.f32 %v1498_v44, %v1415_v23  ;;  %v2264_v46 = vpop.f32.mrb[65].mxu1 }
 0x2fd   : > { %v1501_v47 = vpop.f32.mrb[66].mxu1 }
 0x2fe   : > { %v1516_v31 = vadd.f32 %v1501_v47, %v1416_v26  ;;  %v2265_v48 = vpop.f32.mrb[67].mxu1 }
 0x303   : > { %v1506_v27 = vpop.f32.mrb[68].mxu1 }
 0x304   : > { %v1517_v49 = vadd.f32 %v1506_v27, %v1417_v30  ;;  %v2268_v50 = vpop.f32.mrb[69].mxu1 }
 0x305   : > { %v1509_v52 = vpop.f32.mrb[70].mxu1 }
 0x306   : > { %v1518_v53 = vadd.f32 %v1509_v52, %v1418_v36  ;;  %v2269_v56 = vpop.f32.mrb[71].mxu1 }
 0x30b   : > { %v1574_v55 = vpop.f32.mrb[72].mxu1 }
 0x30c   : > { %v1597_v51 = vadd.f32 %v1574_v55, %v1513_v39  ;;  %v2276_v57 = vpop.f32.mrb[73].mxu1 }
 0x30d   : > { %v1577_v58 = vpop.f32.mrb[74].mxu1 }
 0x30e   : > { %v1598_v60 = vadd.f32 %v1577_v58, %v1514_v42  ;;  %v2277_v61 = vpop.f32.mrb[75].mxu1  ;;  %v1718_v62 = vadd.f32 %v2963_v4, %v1597_v51 }
 0x310   : > { %v1719_v63 = vadd.f32 %v2965_v7, %v1598_v60 }
 0x313   : > { %v1582_v10 = vpop.f32.mrb[76].mxu1 }
 0x314   : > { %v1599_v35 = vadd.f32 %v1582_v10, %v1515_v45  ;;  %v2280_v54 = vpop.f32.mrb[77].mxu1 }
 0x315   : > { %v1585_v0 = vpop.f32.mrb[78].mxu1 }
 0x316   : > { %v1600_v3 = vadd.f32 %v1585_v0, %v1516_v31  ;;  %v2281_v33 = vpop.f32.mrb[79].mxu1  ;;  %v1720_v5 = vadd.f32 %v2967_v12, %v1599_v35 }
 0x318   : > { %v1721_v6 = vadd.f32 %v2969_v59, %v1600_v3 }
 0x31b   : > { %v1590_v8 = vpop.f32.mrb[80].mxu1 }
 0x31c   : > { %v1601_v2 = vadd.f32 %v1590_v8, %v1517_v49  ;;  %v2284_v9 = vpop.f32.mrb[81].mxu1 }
 0x31d   : > { %v1593_v1 = vpop.f32.mrb[82].mxu1 }
 0x31e   : > { %v1602_v13 = vadd.f32 %v1593_v1, %v1518_v53  ;;  %v2285_v11 = vpop.f32.mrb[83].mxu1  ;;  %v1722_v4 = vadd.f32 %v2971_v17, %v1601_v2 }
 0x320   : > { %v1723_v7 = vadd.f32 %v2973_v22, %v1602_v13 }
 0x323   : > { %v1796_v14 = vpop.f32.mrb[84].mxu1 }
 0x324   : > { %v1819_v16 = vadd.f32 %v1796_v14, %v1718_v62  ;;  %v2308_v18 = vpop.f32.mrb[85].mxu1 }
 0x325   : > { %v1799_v12 = vpop.f32.mrb[86].mxu1 }
 0x326   : > { %v1832_v59 = vadd.f32 %v2014_v15, %v1819_v16  ;;  %v1820_v19 = vadd.f32 %v1799_v12, %v1719_v63  ;;  %v2309_v20 = vpop.f32.mrb[87].mxu1 }
 0x328   : > { %1838 = vst.msk [vmem:[%s268_s11] sm:$0xff] %vm900_vm3, %v1832_v59  ;;  %v1833_v17 = vadd.f32 %v2014_v15, %v1820_v19 }
 0x32a   : > { %1839 = vst.msk [vmem:[%s268_s11 + $0x8] sm:$0xff] %vm900_vm3, %v1833_v17 }
 0x32b   : > { %v1804_v22 = vpop.f32.mrb[88].mxu1 }
 0x32c   : > { %v1821_v21 = vadd.f32 %v1804_v22, %v1720_v5  ;;  %v2312_v23 = vpop.f32.mrb[89].mxu1 }
 0x32d   : > { %v1807_v24 = vpop.f32.mrb[90].mxu1 }
 0x32e   : > { %v1834_v25 = vadd.f32 %v2014_v15, %v1821_v21  ;;  %v1822_v26 = vadd.f32 %v1807_v24, %v1721_v6  ;;  %v2313_v28 = vpop.f32.mrb[91].mxu1 }
 0x330   : > { %1840 = vst.msk [vmem:[%s268_s11 + $0x10] sm:$0xff] %vm900_vm3, %v1834_v25  ;;  %v1835_v29 = vadd.f32 %v2014_v15, %v1822_v26 }
 0x332   : > { %1841 = vst.msk [vmem:[%s268_s11 + $0x18] sm:$0xff] %vm900_vm3, %v1835_v29 }
 0x333   : > { %v1812_v30 = vpop.f32.mrb[92].mxu1 }
 0x334   : > { %v1823_v32 = vadd.f32 %v1812_v30, %v1722_v4  ;;  %v2316_v34 = vpop.f32.mrb[93].mxu1 }
 0x335   : > { %v1815_v36 = vpop.f32.mrb[94].mxu1 }
 0x336   : > { %v1836_v37 = vadd.f32 %v2014_v15, %v1823_v32  ;;  %v1824_v38 = vadd.f32 %v1815_v36, %v1723_v7  ;;  %v2317_v39 = vpop.f32.mrb[95].mxu1 }
 0x338   : > { %1842 = vst.msk [vmem:[%s268_s11 + $0x20] sm:$0xff] %vm900_vm3, %v1836_v37  ;;  %v1837_v40 = vadd.f32 %v2014_v15, %v1824_v38 }
 0x33a   : > { %1843 = vst.msk [vmem:[%s268_s11 + $0x28] sm:$0xff] %vm900_vm3, %v1837_v40 }
 0x33b PF: > { %s19_s23 = sadd.s32 1, %s2481_s23  }
 0x33c   : > { %p16_p3 = scmp.ge.s32.totalorder %s19_s23, 4  }
 0x33e   :  { %18 = sbr.rel (!%p16_p3) target bundleno = 4 (0x4), region = 90 }
 0x345   :  { %1865 = vsyncpa [#allocation5], 1 }
 0x346   :  { %1867 = vsyncpa [#allocation5 + $0x1], 1 }

</bundles_post_ra>
